<compile_context>
chip_gen: v7x
topology: tpu7x:2x2x1
jax: 0.10.0
libtpu: 0.0.40
codegen_flags: <defaults>
</compile_context>

<pallas_src>
import jax
import jax.numpy as jnp
from jax.experimental import pallas as pl
from jax.experimental.pallas import tpu as pltpu

LANE = 128
SUBLANE = 8
TARGET_BLOCK_BYTES = 2 * 1024 * 1024     # ~2 MiB per input block (native dtype)
VMEM_LIMIT_BYTES = 32 * 1024 * 1024      # fits v5e / v6e / v7x comfortably


def _make_kernel(*, b_tile, r_tile, r_total, num_k, sub):
    """Kernel factory; all arguments are static Python ints."""
    ragged_r = (r_total % r_tile) != 0

    def _partials(pf, tf):
        s = pf + tf                                   # union contribution
        m = pf * tf                                   # overlap contribution
        if r_tile % 8 == 0:
            g = r_tile // 8
            # (b, r_tile, 128) -> (b, g, 8, 128) is a free retiling of the
            # leading axes; sum(axis=1) lowers to vreg-wise VPU adds only.
            s = s.reshape(b_tile, g, 8, LANE).sum(axis=1)
            m = m.reshape(b_tile, g, 8, LANE).sum(axis=1)
        if sub == 1:
            # single-step-per-sample config: fold the sublane axis now
            # (one cross-sublane reduce per sample — this *is* the finalize).
            s = s.sum(axis=1, keepdims=True)
            m = m.sum(axis=1, keepdims=True)
        return s, m

    def kernel(p_ref, m_ref, u_ref, o_ref):
        def load():
            # sigmoid(x) > 0.5  <=>  x > 0  (exact; no EUP work, no upcast)
            pf = (p_ref[...] > 0).astype(jnp.float32)
            tf = (m_ref[...] > 0.5).astype(jnp.float32)
            return pf, tf

        def write(pf, tf):
            s, m = _partials(pf, tf)
            u_ref[...] = s[:, None]                   # (b_tile, 1, sub, 128)
            o_ref[...] = m[:, None]

        if ragged_r:
            k = pl.program_id(1)
            valid_rows = r_total - (num_k - 1) * r_tile   # static

            @pl.when(k < num_k - 1)
            def _full_block():                        # common path: no masking
                write(*load())

            @pl.when(k == num_k - 1)
            def _ragged_block():                      # only last K block pays this
                pf, tf = load()
                rows = jax.lax.broadcasted_iota(jnp.int32, pf.shape, 1)
                valid = (rows < valid_rows).astype(jnp.float32)
                write(pf * valid, tf * valid)
        else:
            write(*load())

    return kernel


def mean_dice(preds, mask):
    """Pallas TPU implementation of mean_Dice.forward(preds, mask)."""
    N = preds.shape[0]
    D = 1
    for s in preds.shape[1:]:
        D *= s

    # zero-copy reshapes in the native dtypes (never upcast here)
    p2 = preds.reshape(N, D)
    m2 = mask.reshape(N, D)

    if D % LANE != 0:
        # TODO(synk): rare ragged-D path still pays one jnp.pad HBM copy; a
        # dedicated 2-D kernel with in-kernel tail-lane masking would avoid it.
        pad = LANE - (D % LANE)
        p2 = jnp.pad(p2, ((0, 0), (0, pad)))   # 0 > 0   is False for preds
        m2 = jnp.pad(m2, ((0, 0), (0, pad)))   # 0 > 0.5 is False for mask

    d_pad = p2.shape[1]
    R = d_pad // LANE
    p3 = p2.reshape(N, R, LANE)                # zero-copy retiling
    m3 = m2.reshape(N, R, LANE)

    # ---- tile selection: ~2 MiB blocks counted in the native dtype ---------
    itemsize = max(jnp.dtype(preds.dtype).itemsize, jnp.dtype(mask.dtype).itemsize)
    max_rows = max(8, (TARGET_BLOCK_BYTES // (LANE * itemsize)) // 8 * 8)

    if R > max_rows:
        b_tile, r_tile = 1, max_rows           # big samples: tile the R axis
    else:
        r_tile = R                              # small samples: batch them
        b = max_rows // max(R, 1)
        if b >= N:
            b_tile = N
        elif b >= 8:
            b_tile = (b // 8) * 8
        else:
            b_tile = 1

    nb = pl.cdiv(N, b_tile)
    num_k = pl.cdiv(R, r_tile)
    sub = SUBLANE if num_k > 1 else 1
    n_pad = nb * b_tile

    out_sds = jax.ShapeDtypeStruct((n_pad, num_k, sub, LANE), jnp.float32)
    out_spec = pl.BlockSpec((b_tile, 1, sub, LANE), lambda i, k: (i, k, 0, 0))
    in_spec = pl.BlockSpec((b_tile, r_tile, LANE), lambda i, k: (i, k, 0))

    in_bytes = N * d_pad * (jnp.dtype(preds.dtype).itemsize
                            + jnp.dtype(mask.dtype).itemsize)
    out_bytes = 2 * n_pad * num_k * sub * LANE * 4
    cost = pl.CostEstimate(flops=3 * N * d_pad, transcendentals=0,
                           bytes_accessed=in_bytes + out_bytes)

    out_u, out_o = pl.pallas_call(
        _make_kernel(b_tile=b_tile, r_tile=r_tile, r_total=R,
                     num_k=num_k, sub=sub),
        out_shape=(out_sds, out_sds),
        grid_spec=pltpu.PrefetchScalarGridSpec(
            num_scalar_prefetch=0,
            grid=(nb, num_k),
            in_specs=[in_spec, in_spec],
            out_specs=[out_spec, out_spec],
        ),
        compiler_params=pltpu.CompilerParams(
            dimension_semantics=("parallel", "parallel"),
            vmem_limit_bytes=VMEM_LIMIT_BYTES,
        ),
        cost_estimate=cost,
    )(p3, m3)

    # tiny JAX epilogue: cross-lane/chunk reduce, dice divide, batch mean
    union = out_u[:N].sum(axis=(1, 2, 3))
    overlap = out_o[:N].sum(axis=(1, 2, 3))
    dice = 2.0 * overlap / (union + 0.0001)
    return jnp.mean(dice)


if __name__ == "__main__":
    key = jax.random.PRNGKey(0)
    k1, k2 = jax.random.split(key)
    # small shapes consistent with the module: batch=2, channels=4, spatial=16
    preds = jax.random.normal(k1, (2, 4, 16, 16), dtype=jnp.float32)
    mask = jax.random.uniform(k2, (2, 4, 16, 16), dtype=jnp.float32)

    result = mean_dice(preds, mask)
    jax.block_until_ready(result)

    # pure-JAX reference (mirrors the PyTorch module exactly)
    p_ref = (jax.nn.sigmoid(preds) > 0.5).astype(jnp.float32).reshape(2, -1)
    t_ref = (mask > 0.5).astype(jnp.float32).reshape(2, -1)
    dice_ref = 2.0 * (p_ref * t_ref).sum(-1) / (
        p_ref.sum(-1) + t_ref.sum(-1) + 0.0001)
    ref = float(dice_ref.mean())
    assert abs(float(result) - ref) < 1e-5, (float(result), ref)

    print("KERNEL_OK")
</pallas_src>

<mosaic_0001>
module attributes {stable_mosaic.version = 11 : i64} {
  func.func @kernel(%arg0: i32, %arg1: i32, %arg2: memref<2x8x128xf32, #tpu.memory_space<vmem>>, %arg3: memref<2x8x128xf32, #tpu.memory_space<vmem>>, %arg4: memref<2x1x1x128xf32, #tpu.memory_space<vmem>>, %arg5: memref<2x1x1x128xf32, #tpu.memory_space<vmem>>) attributes {dimension_semantics = [#tpu.dimension_semantics<parallel>, #tpu.dimension_semantics<parallel>], iteration_bounds = array<i64: 1, 1>, scalar_prefetch = 0 : i64, scratch_operands = 0 : i64, tpu.core_type = #tpu.core_type<tc>, window_params = [{transform_indices = @transform_0, window_bounds = array<i64: 2, 8, 128>}, {transform_indices = @transform_1, window_bounds = array<i64: 2, 8, 128>}, {transform_indices = @transform_2, window_bounds = array<i64: 2, 1, 1, 128>}, {transform_indices = @transform_3, window_bounds = array<i64: 2, 1, 1, 128>}]} {
    %c0 = arith.constant 0 : index
    %c0_0 = arith.constant 0 : index
    %c0_1 = arith.constant 0 : index
    %0 = vector.load %arg2[%c0, %c0_0, %c0_1] : memref<2x8x128xf32, #tpu.memory_space<vmem>>, vector<2x8x128xf32>
    %cst = arith.constant 0.000000e+00 : f32
    %1 = vector.broadcast %cst : f32 to vector<2x8x128xf32>
    %2 = arith.cmpf ogt, %0, %1 : vector<2x8x128xf32>
    %3 = arith.extui %2 : vector<2x8x128xi1> to vector<2x8x128xi32>
    %4 = arith.sitofp %3 : vector<2x8x128xi32> to vector<2x8x128xf32>
    %c0_2 = arith.constant 0 : index
    %c0_3 = arith.constant 0 : index
    %c0_4 = arith.constant 0 : index
    %5 = vector.load %arg3[%c0_2, %c0_3, %c0_4] : memref<2x8x128xf32, #tpu.memory_space<vmem>>, vector<2x8x128xf32>
    %cst_5 = arith.constant 5.000000e-01 : f32
    %6 = vector.broadcast %cst_5 : f32 to vector<2x8x128xf32>
    %7 = arith.cmpf ogt, %5, %6 : vector<2x8x128xf32>
    %8 = arith.extui %7 : vector<2x8x128xi1> to vector<2x8x128xi32>
    %9 = arith.sitofp %8 : vector<2x8x128xi32> to vector<2x8x128xf32>
    %10 = arith.addf %4, %9 : vector<2x8x128xf32>
    %11 = arith.mulf %4, %9 : vector<2x8x128xf32>
    %12 = vector.shape_cast %10 : vector<2x8x128xf32> to vector<2x1x8x128xf32>
    %cst_6 = arith.constant dense<0.000000e+00> : vector<2x8x128xf32>
    %13 = vector.multi_reduction <add>, %12, %cst_6 [1] : vector<2x1x8x128xf32> to vector<2x8x128xf32>
    %14 = vector.shape_cast %11 : vector<2x8x128xf32> to vector<2x1x8x128xf32>
    %cst_7 = arith.constant dense<0.000000e+00> : vector<2x8x128xf32>
    %15 = vector.multi_reduction <add>, %14, %cst_7 [1] : vector<2x1x8x128xf32> to vector<2x8x128xf32>
    %cst_8 = arith.constant dense<0.000000e+00> : vector<2x128xf32>
    %16 = vector.multi_reduction <add>, %13, %cst_8 [1] : vector<2x8x128xf32> to vector<2x128xf32>
    %17 = vector.shape_cast %16 : vector<2x128xf32> to vector<2x1x128xf32>
    %cst_9 = arith.constant dense<0.000000e+00> : vector<2x128xf32>
    %18 = vector.multi_reduction <add>, %15, %cst_9 [1] : vector<2x8x128xf32> to vector<2x128xf32>
    %19 = vector.shape_cast %18 : vector<2x128xf32> to vector<2x1x128xf32>
    %20 = vector.shape_cast %17 : vector<2x1x128xf32> to vector<2x1x1x128xf32>
    %c0_10 = arith.constant 0 : index
    %c0_11 = arith.constant 0 : index
    %c0_12 = arith.constant 0 : index
    %c0_13 = arith.constant 0 : index
    %21 = vector.load %arg4[%c0_10, %c0_11, %c0_12, %c0_13] : memref<2x1x1x128xf32, #tpu.memory_space<vmem>>, vector<2x1x1x128xf32>
    tpu.vector_store %arg4[%c0_10, %c0_11, %c0_12, %c0_13], %20 {strides = array<i32>} : memref<2x1x1x128xf32, #tpu.memory_space<vmem>>, vector<2x1x1x128xf32>,
    %22 = vector.shape_cast %19 : vector<2x1x128xf32> to vector<2x1x1x128xf32>
    %c0_14 = arith.constant 0 : index
    %c0_15 = arith.constant 0 : index
    %c0_16 = arith.constant 0 : index
    %c0_17 = arith.constant 0 : index
    %23 = vector.load %arg5[%c0_14, %c0_15, %c0_16, %c0_17] : memref<2x1x1x128xf32, #tpu.memory_space<vmem>>, vector<2x1x1x128xf32>
    tpu.vector_store %arg5[%c0_14, %c0_15, %c0_16, %c0_17], %22 {strides = array<i32>} : memref<2x1x1x128xf32, #tpu.memory_space<vmem>>, vector<2x1x1x128xf32>,
    return
  }
  func.func @transform_0(%arg0: i32, %arg1: i32) -> (i32, i32, i32) {
    %c0_i32 = arith.constant 0 : i32
    %c0_i32_0 = arith.constant 0 : i32
    return %arg0, %arg1, %c0_i32 : i32, i32, i32
  }
  func.func @transform_1(%arg0: i32, %arg1: i32) -> (i32, i32, i32) {
    %c0_i32 = arith.constant 0 : i32
    %c0_i32_0 = arith.constant 0 : i32
    return %arg0, %arg1, %c0_i32 : i32, i32, i32
  }
  func.func @transform_2(%arg0: i32, %arg1: i32) -> (i32, i32, i32, i32) {
    %c0_i32 = arith.constant 0 : i32
    %c0_i32_0 = arith.constant 0 : i32
    %c0_i32_1 = arith.constant 0 : i32
    return %arg0, %arg1, %c0_i32, %c0_i32_0 : i32, i32, i32, i32
  }
  func.func @transform_3(%arg0: i32, %arg1: i32) -> (i32, i32, i32, i32) {
    %c0_i32 = arith.constant 0 : i32
    %c0_i32_0 = arith.constant 0 : i32
    %c0_i32_1 = arith.constant 0 : i32
    return %arg0, %arg1, %c0_i32, %c0_i32_0 : i32, i32, i32, i32
  }
}

</mosaic_0001>

<bundles_post_ra>
// kernel: tpu_custom_call.1
= control target key start
LH: loop header
LB: loop body
LE: loop exit
PB: predicated region body
PF: predicated region fallthrough
CT: control target
= control target key end

     0   :  { %9 = vsyncpa [#allocation3], 0  ;;  %s322_s0 = inlined_call_operand.hbm [shape: f32[2,8,128], index: 0, kind: input, shape index: {}]   ;;  %s323_s1 = inlined_call_operand.hbm [shape: f32[2,8,128], index: 1, kind: input, shape index: {}]   ;;  %s324_s2 = inlined_call_operand.hbm [shape: f32[2,1,1,128], index: 2, kind: output, shape index: {0}]   ;;  %s325_s3 = inlined_call_operand.hbm [shape: f32[2,1,1,128], index: 3, kind: output, shape index: {1}]  }
   0x1   :  { %10 = vsyncpa [#allocation6], 0 }
   0x2   :  { %11 = vsyncpa [#allocation4], 0 }
   0x3   :  { %12 = vsyncpa [#allocation9], 0  ;;  %s238_s12 = smov [#allocation2]   ;;  %s142_s16 = scalar_lea.hbm %s322_s0, 256 }
   0x4   :  { %s18_s13 = sshll.u32 %s238_s12, 4  ;;  %p143_p0 = scmp.ne.s32.totalorder %s322_s0, %s142_s16  ;;  %s19_s13 = int_to_ptr.vmem [resolvable:$true] %s18_s13 }
   0x5   :  { %p146_p1 = scmp.lt.u32.totalorder %s142_s16, %s322_s0 }
   0x7   :  { %p148_p2 = pnand %p146_p1, %p143_p0 }
   0x9   :  { %151 = shalt.err (!%p148_p2)
}
   0xa   :  { %s152_s21 = scalar_lea.vmem %s19_s13, 256  ;;  %p157_p4 = scmp.lt.s32.totalorder %s19_s13, %s19_s13 }
   0xb   :  { %p153_p3 = scmp.ne.s32.totalorder %s19_s13, %s152_s21  ;;  %p158_p5 = scmp.lt.s32.totalorder %s152_s21, %s152_s21 }
   0xd   :  { %p159_p6 = por %p158_p5, %p157_p4 }
   0xf   :  { %p160_p7 = pnand %p159_p6, %p153_p3 }
  0x11   :  { %163 = shalt.err (!%p160_p7)
}
  0x12   :  { %s239_s22 = smov 128   ;;  %s240_s23 = smov 8  }
  0x13   :  { %24 = dma.hbm_to_vmem [thread:$0]  %s322_s0, 256, %s19_s13, [#allocation3], %s239_s22, %s239_s22, %s240_s23  }
  0x14   :  { %s241_s26 = smov [#allocation5]   ;;  %s164_s30 = scalar_lea.hbm %s323_s1, 256 }
  0x15   :  { %s30_s27 = sshll.u32 %s241_s26, 4  ;;  %p165_p8 = scmp.ne.s32.totalorder %s323_s1, %s164_s30  ;;  %s31_s27 = int_to_ptr.vmem [resolvable:$true] %s30_s27 }
  0x16   :  { %p168_p9 = scmp.lt.u32.totalorder %s164_s30, %s323_s1 }
  0x18   :  { %p170_p10 = pnand %p168_p9, %p165_p8 }
  0x1a   :  { %173 = shalt.err (!%p170_p10)
}
  0x1b   :  { %s174_s8 = scalar_lea.vmem %s31_s27, 256  ;;  %p179_p12 = scmp.lt.s32.totalorder %s31_s27, %s31_s27 }
  0x1c   :  { %p175_p11 = scmp.ne.s32.totalorder %s31_s27, %s174_s8  ;;  %p180_p13 = scmp.lt.s32.totalorder %s174_s8, %s174_s8 }
  0x1e   :  { %p181_p0 = por %p180_p13, %p179_p12 }
  0x20   :  { %p182_p1 = pnand %p181_p0, %p175_p11 }
  0x22   :  { %185 = shalt.err (!%p182_p1)
}
  0x23   :  { %36 = dma.hbm_to_vmem [thread:$0]  %s323_s1, 256, %s31_s27, [#allocation6], %s239_s22, %s239_s22, %s240_s23  }
  0x24   :  { %230 = dma.done.wait [#allocation3], 256  }
  0x25   :  { %231 = vsyncadd [#allocation3], 4294967040 }
  0x26   :  { %232 = dma.done.wait [#allocation6], 256  }
  0x27   :  { %233 = vsyncadd [#allocation6], 4294967040  ;;  %v43_v0 = vld [vmem:[#allocation2] sm:$0xff]  ;;  %v51_v1 = vld [vmem:[#allocation5] sm:$0xff]  ;;  %v242_v4 = vmov 0.0   ;;  %s243_s1 = smov [#allocation7]  }
  0x28   :  { %v44_v2 = vld [vmem:[#allocation2 + $0x8] sm:$0xff]  ;;  %vm45_vm0 = vcmp.gt.f32.partialorder %v43_v0, 0.0  ;;  %vm53_vm1 = vcmp.gt.f32.partialorder %v51_v1, 0.5  ;;  %v52_v3 = vld [vmem:[#allocation5 + $0x8] sm:$0xff]  ;;  %s100_s10 = sshll.u32 %s243_s1, 4  ;;  %s244_s11 = smov [#allocation8]   ;;  %s101_s10 = int_to_ptr.vmem [resolvable:$true] %s100_s10 }
  0x29   :  { %vm46_vm2 = vcmp.gt.f32.partialorder %v44_v2, 0.0  ;;  %v129_v5 = vsel %vm45_vm0, 1.0, %v242_v4  ;;  %v131_v6 = vsel %vm53_vm1, 1.0, %v242_v4  ;;  %vm54_vm3 = vcmp.gt.f32.partialorder %v52_v3, 0.5  ;;  %s112_s12 = sshll.u32 %s244_s11, 4  ;;  %s186_s13 = scalar_lea.vmem %s101_s10, 32  ;;  %s291_s12 = int_to_ptr.vmem [resolvable:$true] %s112_s12 }
  0x2a   :  { %v130_v7 = vsel %vm46_vm2, 1.0, %v242_v4  ;;  %v59_v8 = vadd.f32 %v131_v6, %v129_v5  ;;  %v132_v9 = vsel %vm54_vm3, 1.0, %v242_v4  ;;  %v61_v10 = vmul.f32 %v131_v6, %v129_v5  ;;  %p187_p2 = scmp.ne.s32.totalorder %s101_s10, %s186_s13  ;;  %p191_p3 = scmp.lt.s32.totalorder %s101_s10, %s101_s10 }
  0x2b   :  { %v60_v11 = vadd.f32 %v132_v9, %v130_v7  ;;  %v62_v12 = vmul.f32 %v132_v9, %v130_v7  ;;  %p192_p4 = scmp.lt.s32.totalorder %s186_s13, %s186_s13 }
  0x2c   :  { %v67_v13 = vrot.slane %v59_v8, 4  ;;  %v79_v14 = vrot.slane %v61_v10, 4 }
  0x2d   :  { %v73_v15 = vrot.slane %v60_v11, 4  ;;  %v85_v16 = vrot.slane %v62_v12, 4  ;;  %p193_p5 = por %p192_p4, %p191_p3 }
  0x2e   :  { %v68_v17 = vadd.f32 %v67_v13, %v59_v8  ;;  %v80_v18 = vadd.f32 %v79_v14, %v61_v10 }
  0x2f   :  { %v74_v19 = vadd.f32 %v73_v15, %v60_v11  ;;  %v86_v20 = vadd.f32 %v85_v16, %v62_v12  ;;  %p194_p6 = pnand %p193_p5, %p187_p2 }
  0x30   :  { %v69_v21 = vrot.slane %v68_v17, 2  ;;  %v81_v22 = vrot.slane %v80_v18, 2 }
  0x31   :  { %v75_v23 = vrot.slane %v74_v19, 2  ;;  %v87_v24 = vrot.slane %v86_v20, 2 }
  0x32   :  { %v70_v25 = vadd.f32 %v69_v21, %v68_v17  ;;  %v82_v26 = vadd.f32 %v81_v22, %v80_v18 }
  0x33   :  { %v76_v27 = vadd.f32 %v75_v23, %v74_v19  ;;  %v88_v28 = vadd.f32 %v87_v24, %v86_v20 }
  0x34   :  { %v71_v29 = vrot.slane %v70_v25, 1  ;;  %v83_v30 = vrot.slane %v82_v26, 1 }
  0x35   :  { %v77_v31 = vrot.slane %v76_v27, 1  ;;  %v89_v32 = vrot.slane %v88_v28, 1 }
  0x36   :  { %v72_v33 = vadd.f32 %v71_v29, %v70_v25  ;;  %v84_v34 = vadd.f32 %v83_v30, %v82_v26 }
  0x37   :  { %v78_v35 = vadd.f32 %v77_v31, %v76_v27  ;;  %v90_v36 = vadd.f32 %v89_v32, %v88_v28 }
  0x38   :  { %91 = vst [vmem:[#allocation7] sm:$0x1] %v72_v33  ;;  %93 = vst [vmem:[#allocation8] sm:$0x1] %v84_v34 }
  0x39   :  { %92 = vst [vmem:[#allocation7 + $0x1] sm:$0x1] %v78_v35  ;;  %94 = vst [vmem:[#allocation8 + $0x1] sm:$0x1] %v90_v36 }
  0x3a   :  { %197 = shalt.err (!%p194_p6)
}
  0x3b   :  { %s198_s16 = scalar_lea.hbm %s324_s2, 32 }
  0x3c   :  { %p199_p7 = scmp.ne.s32.totalorder %s324_s2, %s198_s16  ;;  %p202_p8 = scmp.lt.u32.totalorder %s198_s16, %s324_s2 }
  0x3e   :  { %p204_p9 = pnand %p202_p8, %p199_p7 }
  0x40   :  { %207 = shalt.err (!%p204_p9)
}
  0x41   :  { %s245_s21 = smov 16   ;;  %s246_s22 = smov 1  }
  0x42   :  { %106 = dma.vmem_to_hbm [thread:$0]  %s101_s10, 32, %s324_s2, [#allocation4], %s245_s21, %s245_s21, %s246_s22  }
  0x43   :  { %s208_s25 = scalar_lea.vmem %s291_s12, 32  ;;  %p213_p11 = scmp.lt.s32.totalorder %s291_s12, %s291_s12 }
  0x44   :  { %p209_p10 = scmp.ne.s32.totalorder %s291_s12, %s208_s25  ;;  %p214_p12 = scmp.lt.s32.totalorder %s208_s25, %s208_s25 }
  0x46   :  { %p215_p13 = por %p214_p12, %p213_p11 }
  0x48   :  { %p216_p0 = pnand %p215_p13, %p209_p10 }
  0x4a   :  { %219 = shalt.err (!%p216_p0)
}
  0x4b   :  { %s220_s28 = scalar_lea.hbm %s325_s3, 32 }
  0x4c   :  { %p221_p1 = scmp.ne.s32.totalorder %s325_s3, %s220_s28  ;;  %p224_p2 = scmp.lt.u32.totalorder %s220_s28, %s325_s3 }
  0x4e   :  { %p226_p3 = pnand %p224_p2, %p221_p1 }
  0x50   :  { %229 = shalt.err (!%p226_p3)
}
  0x51   :  { %118 = dma.vmem_to_hbm [thread:$0]  %s291_s12, 32, %s325_s3, [#allocation9], %s245_s21, %s245_s21, %s246_s22  }
  0x52   :  { %234 = dma.done.wait [#allocation4], 32  }
  0x53   :  { %235 = vsyncadd [#allocation4], 4294967264 }
  0x54   :  { %236 = dma.done.wait [#allocation9], 32  }
  0x55   :  { %237 = vsyncadd [#allocation9], 4294967264 }
  0x56   :  { %125 = vsyncpa [#allocation3], 1 }
  0x57   :  { %126 = vsyncpa [#allocation6], 1 }
  0x58   :  { %127 = vsyncpa [#allocation4], 1 }
  0x59   :  { %128 = vsyncpa [#allocation9], 1 }

</bundles_post_ra>
